<compile_context>
chip_gen: v7x
topology: tpu7x:2x2x1
jax: 0.10.0
libtpu: 0.0.40
codegen_flags: <defaults>
</compile_context>

<pallas_src>
import jax
import jax.numpy as jnp
from jax.experimental import pallas as pl
from jax.experimental.pallas import tpu as pltpu

D_IN = 446  # fixed by the module: nn.Linear(446, 1)


def _scores_kernel(x_ref, w_ref, b_ref, s_ref):
    # x_ref: (Bb, Tb, D) VMEM; w_ref: (1, D) f32 VMEM (resident); b_ref: (1,) SMEM;
    # s_ref: (Bb, Tb) f32 VMEM -- sequence axis on lanes (lane-dense output).
    w = w_ref[...]                                   # (1, D) f32
    # Elementwise multiply promotes x (f32 or bf16) to f32 lazily -- no explicit
    # full-tile astype / no second materialized f32 tile.
    s_ref[...] = jnp.sum(x_ref[...] * w, axis=-1) + b_ref[0]


def _softmax_kernel(s_ref, o_ref):
    # s_ref / o_ref: (Bb, T). Softmax over the last (lane) axis == sequence axis.
    s = s_ref[...]
    m = jnp.max(s, axis=-1, keepdims=True)
    e = jnp.exp(s - m)
    o_ref[...] = (e / jnp.sum(e, axis=-1, keepdims=True)).astype(o_ref.dtype)


def _fused_kernel(x_ref, w_ref, b_ref, o_ref):
    # Single-launch path (whole sequence resident): matvec + softmax over lanes.
    w = w_ref[...]                                   # (1, D) f32
    s = jnp.sum(x_ref[...] * w, axis=-1) + b_ref[0]  # (Bb, T) f32
    m = jnp.max(s, axis=-1, keepdims=True)
    e = jnp.exp(s - m)
    o_ref[...] = (e / jnp.sum(e, axis=-1, keepdims=True)).astype(o_ref.dtype)


def _choose_blocks(B, T, itemsize):
    """Pick (Bb, Tb) jointly so Bb*Tb*512*itemsize ~= 16 MiB per x buffer
    (double-buffered footprint < 48 MiB -> safe on v7x's 64 MiB VMEM), with
    Tb a multiple of 128 (or == T) and Bb a multiple of 8 (or == B) so the
    scores stores stay unmasked where the data shape allows."""
    D_PAD = 512                        # 446 features pad to 512 lanes in HBM/VMEM layout
    TARGET_BYTES = 16 * 1024 * 1024    # per x buffer
    target_rows = max(512, TARGET_BYTES // (D_PAD * itemsize))  # ~8192 rows at f32

    b_floor = B if B < 8 else 8        # smallest useful batch block (sublane rule)

    # Sequence block: take the whole sequence if it fits the row budget (enables the
    # fused single-launch path); otherwise the largest multiple of 128 <= 2048.
    if b_floor * T <= target_rows:
        Tb = T
    else:
        Tb = min(T, 2048, max(128, target_rows // b_floor))
        Tb = max(128, (Tb // 128) * 128)
        if Tb > T:
            Tb = T

    # Batch block: fill the remaining row budget; multiple of 8 or full B.
    budget_b = max(1, target_rows // max(Tb, 1))
    if B <= budget_b:
        Bb = B
    else:
        Bb = min(B, max(8, (budget_b // 8) * 8))

    # v7x megacore: give production-sized problems >=2 grid steps along a parallel
    # axis so both TensorCores stream HBM (no effect on v5e/v6e, single TC).
    if B * T >= 4096 and pl.cdiv(B, Bb) * pl.cdiv(T, Tb) < 2:
        if Bb > 8 and (Bb // 2) % 8 == 0:
            Bb //= 2
        elif Tb >= 256 and (Tb // 2) % 128 == 0:
            Tb //= 2

    return Bb, Tb


def attention_weights(lstm_output, weight, bias):
    """lstm_output: (B, T, 446) (f32 or bf16); weight: (1, 446); bias: (1,).

    Returns softmax(lstm_output @ weight.T + bias, dim=1) with shape (B, T, 1),
    in lstm_output's dtype (matches the PyTorch module).
    """
    B, T, D = lstm_output.shape
    assert D == D_IN
    assert weight.shape == (1, D_IN)
    assert bias.shape == (1,)

    # Keep the parameters f32 so the in-kernel elementwise promote accumulates in f32
    # even when x is bf16.
    w32 = weight.astype(jnp.float32)
    b32 = bias.astype(jnp.float32)

    itemsize = jnp.dtype(lstm_output.dtype).itemsize
    Bb, Tb = _choose_blocks(B, T, itemsize)
    vmem_cap = 48 * 1024 * 1024  # < v7x's 64 MiB/TC; comfortably below v5e/v6e physical

    if Tb == T:
        # Single fused launch: scores + softmax over the full lane-resident sequence.
        weights_bt = pl.pallas_call(
            _fused_kernel,
            out_shape=jax.ShapeDtypeStruct((B, T), lstm_output.dtype),
            grid=(pl.cdiv(B, Bb),),
            in_specs=[
                pl.BlockSpec((Bb, T, D), lambda i: (i, 0, 0)),      # x tile (double-buffered)
                pl.BlockSpec((1, D), lambda i: (0, 0)),             # weight, resident in VMEM
                pl.BlockSpec(memory_space=pltpu.MemorySpace.SMEM),  # bias scalar
            ],
            out_specs=pl.BlockSpec((Bb, T), lambda i: (i, 0)),
            compiler_params=pltpu.CompilerParams(
                dimension_semantics=("parallel",),
                vmem_limit_bytes=vmem_cap,
            ),
        )(lstm_output, w32, b32)
    else:
        # Pass 1: stream x once from HBM -> lane-dense (B, T) f32 scores.
        scores = pl.pallas_call(
            _scores_kernel,
            out_shape=jax.ShapeDtypeStruct((B, T), jnp.float32),
            grid=(pl.cdiv(B, Bb), pl.cdiv(T, Tb)),
            in_specs=[
                pl.BlockSpec((Bb, Tb, D), lambda i, j: (i, j, 0)),
                pl.BlockSpec((1, D), lambda i, j: (0, 0)),
                pl.BlockSpec(memory_space=pltpu.MemorySpace.SMEM),
            ],
            out_specs=pl.BlockSpec((Bb, Tb), lambda i, j: (i, j)),
            compiler_params=pltpu.CompilerParams(
                dimension_semantics=("parallel", "parallel"),
                vmem_limit_bytes=vmem_cap,
            ),
        )(lstm_output, w32, b32)

        # Pass 2: softmax over the sequence (lane) axis of the (B, T) scores.
        # Batch block sized so 2 double-buffered f32 refs of (Bb2, T) fit ~40 MiB.
        bb2_cap = max(0, (40 * 1024 * 1024) // (16 * T))
        Bb2 = B if B <= 8 else min(B, max(8, (bb2_cap // 8) * 8))
        # TODO(synk): for extremely long T (>~300K rows of f32) stream T in blocks
        # with a running max/sum + normalize step instead of a full-T VMEM row.
        weights_bt = pl.pallas_call(
            _softmax_kernel,
            out_shape=jax.ShapeDtypeStruct((B, T), lstm_output.dtype),
            grid=(pl.cdiv(B, Bb2),),
            in_specs=[pl.BlockSpec((Bb2, T), lambda i: (i, 0))],
            out_specs=pl.BlockSpec((Bb2, T), lambda i: (i, 0)),
            compiler_params=pltpu.CompilerParams(
                dimension_semantics=("parallel",),
                vmem_limit_bytes=vmem_cap,
            ),
        )(scores)

    # Match nn.Linear(446, 1) + torch.softmax(dim=1): output (B, T, 1).
    return weights_bt.reshape(B, T, 1)


if __name__ == "__main__":
    key = jax.random.PRNGKey(0)
    k_x, k_w, k_b = jax.random.split(key, 3)

    B, T = 2, 8  # small demo shapes; feature dim is fixed to 446 by the module
    x = jax.random.normal(k_x, (B, T, D_IN), dtype=jnp.float32)

    # Deterministic parameter init mimicking nn.Linear's U(-1/sqrt(fan_in), 1/sqrt(fan_in)).
    bound = 1.0 / jnp.sqrt(jnp.float32(D_IN))
    weight = jax.random.uniform(k_w, (1, D_IN), minval=-bound, maxval=bound, dtype=jnp.float32)
    bias = jax.random.uniform(k_b, (1,), minval=-bound, maxval=bound, dtype=jnp.float32)

    out = attention_weights(x, weight, bias)
    out = jax.block_until_ready(out)

    # Pure-JAX reference for sanity.
    ref_scores = jnp.einsum("btd,od->bto", x, weight) + bias
    ref = jax.nn.softmax(ref_scores, axis=1)
    assert out.shape == (B, T, 1)
    assert jnp.allclose(out, ref, atol=1e-5, rtol=1e-5)

    print("KERNEL_OK")
</pallas_src>

<mosaic_0001>
module attributes {stable_mosaic.version = 11 : i64} {
  func.func @_fused_kernel(%arg0: i32, %arg1: memref<2x8x446xf32, #tpu.memory_space<vmem>>, %arg2: memref<1x446xf32, #tpu.memory_space<vmem>>, %arg3: memref<1xf32, #tpu.memory_space<smem>>, %arg4: memref<2x8xf32, #tpu.memory_space<vmem>>) attributes {dimension_semantics = [#tpu.dimension_semantics<parallel>], iteration_bounds = array<i64: 1>, scalar_prefetch = 0 : i64, scratch_operands = 0 : i64, tpu.core_type = #tpu.core_type<tc>, window_params = [{transform_indices = @transform_0, window_bounds = array<i64: 2, 8, 446>}, {pipeline_mode = #tpu.pipeline_mode<synchronous>, transform_indices = @transform_1, window_bounds = array<i64: 1, 446>}, {transform_indices = @transform_2, window_bounds = array<i64: 1>}, {transform_indices = @transform_3, window_bounds = array<i64: 2, 8>}]} {
    %c0 = arith.constant 0 : index
    %c0_0 = arith.constant 0 : index
    %0 = vector.load %arg2[%c0, %c0_0] : memref<1x446xf32, #tpu.memory_space<vmem>>, vector<1x446xf32>
    %c0_1 = arith.constant 0 : index
    %c0_2 = arith.constant 0 : index
    %c0_3 = arith.constant 0 : index
    %1 = vector.load %arg1[%c0_1, %c0_2, %c0_3] : memref<2x8x446xf32, #tpu.memory_space<vmem>>, vector<2x8x446xf32>
    %2 = vector.shape_cast %0 : vector<1x446xf32> to vector<1x1x446xf32>
    %3 = vector.broadcast %2 : vector<1x1x446xf32> to vector<2x8x446xf32>
    %4 = arith.mulf %1, %3 : vector<2x8x446xf32>
    %cst = arith.constant dense<0.000000e+00> : vector<2x8xf32>
    %5 = vector.multi_reduction <add>, %4, %cst [2] : vector<2x8x446xf32> to vector<2x8xf32>
    %c0_4 = arith.constant 0 : index
    %6 = memref.load %arg3[%c0_4] : memref<1xf32, #tpu.memory_space<smem>>
    %7 = vector.broadcast %6 : f32 to vector<2x8xf32>
    %8 = arith.addf %5, %7 : vector<2x8xf32>
    %cst_5 = arith.constant dense<0xFF800000> : vector<2xf32>
    %9 = vector.multi_reduction <maximumf>, %8, %cst_5 [1] : vector<2x8xf32> to vector<2xf32>
    %10 = vector.shape_cast %9 : vector<2xf32> to vector<2x1xf32>
    %11 = vector.broadcast %10 : vector<2x1xf32> to vector<2x8xf32>
    %12 = arith.subf %8, %11 : vector<2x8xf32>
    %13 = math.exp %12 : vector<2x8xf32>
    %cst_6 = arith.constant dense<0.000000e+00> : vector<2xf32>
    %14 = vector.multi_reduction <add>, %13, %cst_6 [1] : vector<2x8xf32> to vector<2xf32>
    %15 = vector.shape_cast %14 : vector<2xf32> to vector<2x1xf32>
    %16 = vector.broadcast %15 : vector<2x1xf32> to vector<2x8xf32>
    %17 = arith.divf %13, %16 : vector<2x8xf32>
    %c0_7 = arith.constant 0 : index
    %c0_8 = arith.constant 0 : index
    %18 = vector.load %arg4[%c0_7, %c0_8] : memref<2x8xf32, #tpu.memory_space<vmem>>, vector<2x8xf32>
    tpu.vector_store %arg4[%c0_7, %c0_8], %17 {strides = array<i32>} : memref<2x8xf32, #tpu.memory_space<vmem>>, vector<2x8xf32>,
    return
  }
  func.func @transform_0(%arg0: i32) -> (i32, i32, i32) {
    %c0_i32 = arith.constant 0 : i32
    %c0_i32_0 = arith.constant 0 : i32
    %c0_i32_1 = arith.constant 0 : i32
    return %arg0, %c0_i32, %c0_i32_0 : i32, i32, i32
  }
  func.func @transform_1(%arg0: i32) -> (i32, i32) {
    %c0_i32 = arith.constant 0 : i32
    %c0_i32_0 = arith.constant 0 : i32
    %c0_i32_1 = arith.constant 0 : i32
    return %c0_i32, %c0_i32_0 : i32, i32
  }
  func.func @transform_2(%arg0: i32) -> i32 {
    %c0_i32 = arith.constant 0 : i32
    %c0_i32_0 = arith.constant 0 : i32
    return %c0_i32 : i32
  }
  func.func @transform_3(%arg0: i32) -> (i32, i32) {
    %c0_i32 = arith.constant 0 : i32
    %c0_i32_0 = arith.constant 0 : i32
    return %arg0, %c0_i32 : i32, i32
  }
}

</mosaic_0001>

<bundles_post_ra>
// kernel: tpu_custom_call.1
= control target key start
LH: loop header
LB: loop body
LE: loop exit
PB: predicated region body
PF: predicated region fallthrough
CT: control target
= control target key end

     0   :  { %9 = vsyncpa [#allocation4], 0  ;;  %s335_s0 = inlined_call_operand.hbm [shape: f32[2,8,446], index: 0, kind: input, shape index: {}]   ;;  %s336_s1 = inlined_call_operand.vmem [shape: f32[1,446], index: 1, kind: input, shape index: {}]   ;;  %s337_s2 = inlined_call_operand.<no memory space> [shape: f32[1], index: 2, kind: input, shape index: {}]   ;;  %s338_s3 = inlined_call_operand.hbm [shape: f32[2,8], index: 3, kind: output, shape index: {}]  }
   0x1   :  { %10 = vsyncpa [#allocation5], 0  ;;  %s254_s12 = smov [#allocation3]   ;;  %s206_s16 = scalar_lea.hbm %s335_s0, 1024 }
   0x2   :  { %s16_s13 = sshll.u32 %s254_s12, 4  ;;  %p207_p0 = scmp.ne.s32.totalorder %s335_s0, %s206_s16  ;;  %s17_s13 = int_to_ptr.vmem [resolvable:$true] %s16_s13 }
   0x3   :  { %p210_p1 = scmp.lt.u32.totalorder %s206_s16, %s335_s0 }
   0x5   :  { %p212_p2 = pnand %p210_p1, %p207_p0 }
   0x7   :  { %215 = shalt.err (!%p212_p2)
}
   0x8   :  { %s216_s21 = scalar_lea.vmem %s17_s13, 1024  ;;  %p221_p4 = scmp.lt.s32.totalorder %s17_s13, %s17_s13 }
   0x9   :  { %p217_p3 = scmp.ne.s32.totalorder %s17_s13, %s216_s21  ;;  %p222_p5 = scmp.lt.s32.totalorder %s216_s21, %s216_s21 }
   0xb   :  { %p223_p6 = por %p222_p5, %p221_p4 }
   0xd   :  { %p224_p7 = pnand %p223_p6, %p217_p3 }
   0xf   :  { %227 = shalt.err (!%p224_p7)
}
  0x10   :  { %s255_s22 = smov 512   ;;  %s256_s23 = smov 32  }
  0x11   :  { %22 = dma.hbm_to_vmem [thread:$0]  %s335_s0, 1024, %s17_s13, [#allocation4], %s255_s22, %s255_s22, %s256_s23  }
  0x12   :  { %250 = dma.done.wait [#allocation4], 1024  }
  0x13   :  { %251 = vsyncadd [#allocation4], 4294966272  ;;  %v40_v0 = vlaneseq  ;;  %v30_v8 = vld [vmem:[%s336_s1] sm:$0xf]  ;;  %v32_v10 = vld [vmem:[#allocation3 + $0x8] sm:$0xff]  ;;  %vm70_vm0 = vcmask 506880   ;;  %v82_v37 = vstv %s337_s2 }
  0x14   :  { %v31_v9 = vld [vmem:[#allocation3] sm:$0xff]  ;;  %v33_v11 = vld [vmem:[#allocation3 + $0x10] sm:$0xff]  ;;  %v34_v12 = vld [vmem:[#allocation3 + $0x18] sm:$0xff]  ;;  %vm97_vm1 = vcmask 1041409   ;;  %vm100_vm2 = vcmask 58368   ;;  %v257_v46 = vmov 0  }
  0x15   :  { %v41_v1 = vshrl.u32 %v40_v0, 7  ;;  %v88_v2 = vand.u32 127, %v40_v0  ;;  %v35_v17 = vld [vmem:[#allocation3 + $0x20] sm:$0xff]  ;;  %v36_v18 = vld [vmem:[#allocation3 + $0x28] sm:$0xff]  ;;  %v37_v19 = vld [vmem:[#allocation3 + $0x30] sm:$0xff]  ;;  %197 = vset.pattern.permute.xlu0 %v257_v46  ;;  %196 = vset.pattern.permute.xlu1 %v257_v46  ;;  %s258_s2 = smov [#allocation6]  }
  0x16   :  { %v38_v20 = vld [vmem:[#allocation3 + $0x38] sm:$0xff]  ;;  %s182_s28 = sshll.u32 %s258_s2, 4  ;;  %s183_s28 = int_to_ptr.vmem [resolvable:$true] %s182_s28 }
  0x17   :  { %v291_v3 = vsub.s32 0, %v41_v1  ;;  %v293_v4 = vsub.s32 1, %v41_v1  ;;  %v50_v5 = vsub.s32 2, %v41_v1  ;;  %v54_v6 = vsub.s32 3, %v41_v1  ;;  %s228_s29 = scalar_lea.vmem %s183_s28, 32  ;;  %p233_p9 = scmp.lt.s32.totalorder %s183_s28, %s183_s28 }
  0x18   :  { %v295_v7 = vsub.s32 %v88_v2, %v41_v1  ;;  %p229_p8 = scmp.ne.s32.totalorder %s183_s28, %s228_s29  ;;  %p234_p10 = scmp.lt.s32.totalorder %s228_s29, %s228_s29 }
  0x19   :  { %v43_v13 = vrot.slane %v30_v8, %v291_v3  ;;  %v47_v14 = vrot.slane %v30_v8, %v293_v4  ;;  %v51_v15 = vrot.slane %v30_v8, %v50_v5  ;;  %v55_v16 = vrot.slane %v30_v8, %v54_v6 }
  0x1a   :  { %p235_p11 = por %p234_p10, %p233_p9 }
  0x1b   :  { %v60_v21 = vmul.f32 %v43_v13, %v31_v9  ;;  %v61_v22 = vmul.f32 %v47_v14, %v32_v10  ;;  %v62_v23 = vmul.f32 %v51_v15, %v33_v11  ;;  %v63_v24 = vmul.f32 %v55_v16, %v34_v12 }
  0x1c   :  { %v64_v25 = vmul.f32 %v43_v13, %v35_v17  ;;  %v65_v26 = vmul.f32 %v47_v14, %v36_v18  ;;  %v66_v27 = vmul.f32 %v51_v15, %v37_v19  ;;  %v67_v28 = vmul.f32 %v55_v16, %v38_v20  ;;  %p236_p12 = pnand %p235_p11, %p229_p8 }
  0x1d   :  { %v68_v29 = vadd.f32 %v61_v22, %v60_v21  ;;  %v71_v30 = vsel %vm70_vm0, %v63_v24, 0.0 }
  0x1e   :  { %v75_v31 = vadd.f32 %v65_v26, %v64_v25  ;;  %v77_v34 = vsel %vm70_vm0, %v67_v28, 0.0 }
  0x1f   :  { %v69_v32 = vadd.f32 %v68_v29, %v62_v23 }
  0x20   :  { %v76_v33 = vadd.f32 %v75_v31, %v66_v27 }
  0x21   :  { %v72_v35 = vadd.f32 %v71_v30, %v69_v32 }
  0x22   :  { %v78_v36 = vadd.f32 %v77_v34, %v76_v33 }
  0x23   :  { %73 = vadd.xlane.f32.xlu0 %v72_v35 }
  0x27   :  { %79 = vadd.xlane.f32.xlu0 %v78_v36 }
  0xb0   :  { %v74_v38 = vpop.xlane.xlu0 %73 }
  0xb1   :  { %v83_v39 = vadd.f32 %v82_v37, %v74_v38 }
  0xb3   :  { %v92_v42 = vrot.slane %v83_v39, %v295_v7 }
  0xb4   :  { %v80_v40 = vpop.xlane.xlu0 %79 }
  0xb5   :  { %v84_v41 = vadd.f32 %v82_v37, %v80_v40 }
  0xb7   :  { %v96_v43 = vrot.slane %v84_v41, %v295_v7 }
  0xb9   :  { %v98_v44 = vsel %vm97_vm1, %v96_v43, %v92_v42 }
  0xba   :  { %v101_v45 = vsel %vm100_vm2, %v98_v44, -inf }
  0xbb   :  { %102 = vmax.xlane.f32.xlu1 %v101_v45 }
 0x148   :  { %v103_v47 = vpop.xlane.xlu1 %102 }
 0x149   :  { %v108_v48 = vrot.slane %v103_v47, %v291_v3  ;;  %v112_v49 = vrot.slane %v103_v47, %v293_v4 }
 0x14b   :  { %v115_v50 = vsub.f32 %v83_v39, %v108_v48  ;;  %v116_v51 = vsub.f32 %v84_v41, %v112_v49 }
 0x14d   :  { %v117_v52 = vmul.f32 1.442695, %v115_v50  ;;  %v119_v53 = vmul.f32 1.442695, %v116_v51 }
 0x14f   :  { %198 = vpow2.f32 %v117_v52 }
 0x150   :  { %200 = vpow2.f32 %v119_v53 }
 0x159   :  { %v199_v54 = vpop.eup %198 }
 0x15a   :  { %v201_v55 = vpop.eup %200  ;;  %124 = vperm.xlu1 %196, %v199_v54  }
 0x15b   :  { %127 = vperm.xlu0 %197, %v201_v55  }
 0x1d9   :  { %v125_v56 = vpop.permute.xlu1 %124 }
 0x1da   :  { %v128_v57 = vpop.permute.xlu0 %127  ;;  %v132_v58 = vrot.slane %v125_v56, %v295_v7 }
 0x1db   :  { %v136_v59 = vrot.slane %v128_v57, %v295_v7 }
 0x1dd   :  { %v137_v60 = vsel %vm97_vm1, %v136_v59, %v132_v58 }
 0x1de   :  { %v139_v61 = vsel %vm100_vm2, %v137_v60, 0.0 }
 0x1df   :  { %140 = vadd.xlane.f32.xlu1 %v139_v61 }
 0x26c   :  { %v141_v62 = vpop.xlane.xlu1 %140 }
 0x26d   :  { %v146_v63 = vrot.slane %v141_v62, %v291_v3  ;;  %v150_v0 = vrot.slane %v141_v62, %v293_v4 }
 0x26f   :  { %202 = vrcp.f32 %v146_v63 }
 0x270   :  { %204 = vrcp.f32 %v150_v0 }
 0x279   :  { %v203_v1 = vpop.eup %202 }
 0x27a   :  { %v154_v2 = vmul.f32 %v203_v1, %v199_v54  ;;  %v205_v5 = vpop.eup %204 }
 0x27b   :  { %v156_v6 = vmul.f32 %v205_v5, %v201_v55 }
 0x27c   :  { %160 = vperm.xlu0 %197, %v154_v2  }
 0x280   :  { %163 = vperm.xlu0 %197, %v156_v6  }
 0x2fb   :  { %v161_v8 = vpop.permute.xlu0 %160 }
 0x2fc   :  { %v168_v10 = vrot.slane %v161_v8, %v295_v7 }
 0x2ff   :  { %v164_v9 = vpop.permute.xlu0 %163 }
 0x300   :  { %v172_v11 = vrot.slane %v164_v9, %v295_v7 }
 0x302   :  { %v173_v3 = vsel %vm97_vm1, %v172_v11, %v168_v10 }
 0x303   :  { %175 = vst.msk [vmem:[#allocation6] sm:$0x3] %vm100_vm2, %v173_v3 }
 0x304   :  { %239 = shalt.err (!%p236_p12)
}
 0x305   :  { %s240_s5 = scalar_lea.hbm %s338_s3, 32 }
 0x306   :  { %p241_p13 = scmp.ne.s32.totalorder %s338_s3, %s240_s5  ;;  %p244_p0 = scmp.lt.u32.totalorder %s240_s5, %s338_s3 }
 0x308   :  { %p246_p1 = pnand %p244_p0, %p241_p13 }
 0x30a   :  { %249 = shalt.err (!%p246_p1)
}
 0x30b   :  { %185 = dma.vmem_to_hbm [thread:$0]  %s183_s28, 32, %s338_s3, [#allocation5]  }
 0x30c   :  { %252 = dma.done.wait [#allocation5], 32  }
 0x30d   :  { %253 = vsyncadd [#allocation5], 4294967264 }
 0x30e   :  { %189 = vsyncpa [#allocation4], 1 }
 0x30f   :  { %190 = vsyncpa [#allocation5], 1 }

</bundles_post_ra>
